<compile_context>
chip_gen: v7x
topology: tpu7x:2x2x1
jax: 0.10.0
libtpu: 0.0.40
codegen_flags: <defaults>
</compile_context>

<pallas_src>
import jax
import jax.numpy as jnp
from jax import lax
from jax.experimental import pallas as pl
from jax.experimental.pallas import tpu as pltpu

_BN_EPS = 1e-5
_LANE = 128


def _round_up(x, m):
    return (x + m - 1) // m * m


# ---------------------------------------------------------------------------
# Pass 1: partial-conv matmul + mask-ratio rescale.  Emits per-(batch, tile)
# partial per-channel sum / sum-of-squares for the BatchNorm batch statistics.
# Block layout: channels on sublanes, pixels on lanes (lane-dense stores).
# ---------------------------------------------------------------------------
def _pconv_scale_stats_kernel(xcol_ref, w_ref, ratio_ref, y_ref, psum_ref, psq_ref):
    # (Cout_pad, K) @ (K, THW) on the MXU; bf16 (or f32) operands, f32 accumulation.
    raw = jnp.dot(w_ref[...], xcol_ref[0], preferred_element_type=jnp.float32)
    # Partial-conv rescale; ratio is (1, THW) and broadcasts across channel sublanes.
    y = raw * ratio_ref[0]
    y_ref[0] = y
    # Per-tile BN partials (lane-axis XLU reduce); summed across tiles in the wrapper,
    # so no cross-iteration state and both grid axes stay "parallel" (megacore-safe).
    psum_ref[0, 0] = jnp.sum(y, axis=1, keepdims=True)
    psq_ref[0, 0] = jnp.sum(y * y, axis=1, keepdims=True)


# ---------------------------------------------------------------------------
# Pass 2: folded BatchNorm affine (scale/shift from batch stats) + ReLU, in place.
# ---------------------------------------------------------------------------
def _bn_relu_kernel(y_ref, scale_ref, shift_ref, out_ref):
    out_ref[0] = jnp.maximum(y_ref[0] * scale_ref[...] + shift_ref[...], 0.0)


def pconv_bn_activ_forward(images, masks, weight, gamma, beta, *,
                           block_rows=2048, mxu_dtype=jnp.bfloat16):
    """images, masks: (N, Cin, H, W) NCHW; weight: (Cout, Cin, 3, 3); gamma/beta: (Cout,)."""
    N, Cin, H, W = images.shape
    Cout = weight.shape[0]
    HW = H * W
    K = 9 * Cin                       # true contraction length; NOT padded to 128
    R = N * HW
    slide_winsize = float(Cin * 9)
    f32 = jnp.float32

    Cp = _round_up(Cout, 8)                                           # channel (sublane) granule
    THW = min(_round_up(block_rows, _LANE), _round_up(HW, _LANE))     # pixel (lane) tile
    HWp = _round_up(HW, THW)
    n_t = HWp // THW

    x = images.astype(f32)
    m = masks.astype(f32)

    # --- mask bookkeeping (tiny; done once in the wrapper, no (R, K) mask patches) ---
    msum_c = jnp.sum(m, axis=1)                                   # (N, H, W): sum over Cin
    msp = jnp.pad(msum_c, ((0, 0), (1, 1), (1, 1)))
    msum = sum(msp[:, kh:kh + H, kw:kw + W]
               for kh in range(3) for kw in range(3))             # 3x3 window sum
    mask_ratio = slide_winsize / (msum + 1e-8)
    update_mask = jnp.clip(msum, 0.0, 1.0)
    mask_ratio = mask_ratio * update_mask                         # (N, H, W)

    # --- im2col of the masked input, NCHW-native, (tap, ci) contraction ordering ---
    xm = jnp.pad(x * m, ((0, 0), (0, 0), (1, 1), (1, 1)))
    cols = jnp.stack([xm[:, :, kh:kh + H, kw:kw + W]
                      for kh in range(3) for kw in range(3)], axis=1)   # (N, 9, Cin, H, W)
    xcol = cols.reshape(N, K, HW).astype(mxu_dtype)
    xcol = jnp.pad(xcol, ((0, 0), (0, 0), (0, HWp - HW)))

    ratio = jnp.pad(mask_ratio.reshape(N, 1, HW), ((0, 0), (0, 0), (0, HWp - HW)))

    # (Cout, Cin, kh, kw) -> (Cout, kh, kw, Cin) -> (Cout, K): matches im2col ordering.
    w2d = jnp.transpose(weight.astype(f32), (0, 2, 3, 1)).reshape(Cout, K)
    w2d = jnp.pad(w2d, ((0, Cp - Cout), (0, 0))).astype(mxu_dtype)

    grid = (N, n_t)
    cparams = pltpu.CompilerParams(
        dimension_semantics=("parallel", "parallel"),
        vmem_limit_bytes=32 * 1024 * 1024)

    y, psum, psq = pl.pallas_call(
        _pconv_scale_stats_kernel,
        out_shape=(jax.ShapeDtypeStruct((N, Cp, HWp), f32),
                   jax.ShapeDtypeStruct((N, n_t, Cp, 1), f32),
                   jax.ShapeDtypeStruct((N, n_t, Cp, 1), f32)),
        grid=grid,
        in_specs=[pl.BlockSpec((1, K, THW), lambda n, t: (n, 0, t)),
                  # constant index_map: invariant weight block stays resident in VMEM
                  pl.BlockSpec((Cp, K), lambda n, t: (0, 0)),
                  pl.BlockSpec((1, 1, THW), lambda n, t: (n, 0, t))],
        out_specs=(pl.BlockSpec((1, Cp, THW), lambda n, t: (n, 0, t)),
                   pl.BlockSpec((1, 1, Cp, 1), lambda n, t: (n, t, 0, 0)),
                   pl.BlockSpec((1, 1, Cp, 1), lambda n, t: (n, t, 0, 0))),
        compiler_params=cparams,
    )(xcol, w2d, ratio)

    # --- fold BN batch statistics into per-channel scale/shift (wrapper, tiny) ---
    # Padded pixels/channels contribute exactly zero; divide by the true count R.
    # TODO(synk): running_mean / running_var buffer updates (stateful side effect) not replicated.
    tot_sum = jnp.sum(psum[..., 0], axis=(0, 1))                  # (Cp,)
    tot_sq = jnp.sum(psq[..., 0], axis=(0, 1))
    mean = tot_sum / R
    # TODO(synk): E[y^2]-mean^2 stats can lose precision for very large N*H*W; fine at these sizes.
    var = jnp.maximum(tot_sq / R - mean * mean, 0.0)
    gamma_p = jnp.pad(gamma.astype(f32), (0, Cp - Cout))
    beta_p = jnp.pad(beta.astype(f32), (0, Cp - Cout))
    scale = gamma_p / jnp.sqrt(var + _BN_EPS)
    shift = beta_p - mean * scale

    out = pl.pallas_call(
        _bn_relu_kernel,
        out_shape=jax.ShapeDtypeStruct((N, Cp, HWp), f32),
        grid=grid,
        in_specs=[pl.BlockSpec((1, Cp, THW), lambda n, t: (n, 0, t)),
                  pl.BlockSpec((Cp, 1), lambda n, t: (0, 0)),
                  pl.BlockSpec((Cp, 1), lambda n, t: (0, 0))],
        out_specs=pl.BlockSpec((1, Cp, THW), lambda n, t: (n, 0, t)),
        input_output_aliases={0: 0},        # BN+ReLU in place over y (no extra slab)
        compiler_params=cparams,
    )(y, scale.reshape(Cp, 1), shift.reshape(Cp, 1))

    # (N, Cout, H*W) -> (N, Cout, H, W): pure reshape, no transpose / extra round trip.
    images_out = out[:, :Cout, :HW].reshape(N, Cout, H, W)
    # update_mask is identical across output channels -> broadcast outside the kernel.
    masks_out = jnp.broadcast_to(update_mask[:, None, :, :], (N, Cout, H, W))
    return images_out, masks_out


def _reference(images, masks, weight, gamma, beta):
    """Pure-JAX reference mirroring the PyTorch forward (for correctness check)."""
    Cout, Cin = weight.shape[0], weight.shape[1]
    dn = ('NCHW', 'OIHW', 'NCHW')
    xm = images * masks
    raw = lax.conv_general_dilated(xm, weight, (1, 1), ((1, 1), (1, 1)),
                                   dimension_numbers=dn)
    ones_w = jnp.ones((Cout, Cin, 3, 3), jnp.float32)
    umask = lax.conv_general_dilated(masks, ones_w, (1, 1), ((1, 1), (1, 1)),
                                     dimension_numbers=dn)
    ratio = float(Cin * 9) / (umask + 1e-8)
    umask_c = jnp.clip(umask, 0.0, 1.0)
    out = raw * (ratio * umask_c)
    mean = out.mean(axis=(0, 2, 3), keepdims=True)
    var = out.var(axis=(0, 2, 3), keepdims=True)
    out = (out - mean) / jnp.sqrt(var + 1e-5)
    out = out * gamma.reshape(1, -1, 1, 1) + beta.reshape(1, -1, 1, 1)
    out = jnp.maximum(out, 0.0)
    return out, umask_c


if __name__ == "__main__":
    key = jax.random.PRNGKey(0)
    k_img, k_msk, k_w, k_g, k_b = jax.random.split(key, 5)

    N, Cin, Cout, H, W = 2, 4, 8, 16, 16
    images = jax.random.normal(k_img, (N, Cin, H, W), dtype=jnp.float32)
    masks = jax.random.bernoulli(k_msk, 0.7, (N, Cin, H, W)).astype(jnp.float32)

    # Deterministic synthetic parameters (conv weight, BN affine params).
    weight = 0.1 * jax.random.normal(k_w, (Cout, Cin, 3, 3), dtype=jnp.float32)
    gamma = 1.0 + 0.1 * jax.random.normal(k_g, (Cout,), dtype=jnp.float32)
    beta = 0.1 * jax.random.normal(k_b, (Cout,), dtype=jnp.float32)

    fwd = jax.jit(pconv_bn_activ_forward, static_argnames=("block_rows", "mxu_dtype"))
    img_ref, msk_ref = _reference(images, masks, weight, gamma, beta)

    # Default (bf16 MXU operands); block_rows=128 -> 2 pixel tiles per batch element,
    # exercising the multi-tile partial-stats reduction path (grid = (2, 2)).
    img_out, msk_out = fwd(images, masks, weight, gamma, beta, block_rows=128)
    jax.block_until_ready((img_out, msk_out))
    assert img_out.shape == (N, Cout, H, W) and msk_out.shape == (N, Cout, H, W)
    assert jnp.allclose(img_out, img_ref, rtol=5e-2, atol=5e-2)
    assert jnp.allclose(msk_out, msk_ref, rtol=1e-5, atol=1e-5)

    # f32 MXU fallback keeps the tight 1e-4 numerical fidelity of the original check.
    img_f32, msk_f32 = fwd(images, masks, weight, gamma, beta,
                           block_rows=128, mxu_dtype=jnp.float32)
    jax.block_until_ready((img_f32, msk_f32))
    assert jnp.allclose(img_f32, img_ref, rtol=1e-4, atol=1e-4)
    assert jnp.allclose(msk_f32, msk_ref, rtol=1e-5, atol=1e-5)

    print("KERNEL_OK")
</pallas_src>

<mosaic_0001>
module attributes {stable_mosaic.version = 11 : i64} {
  func.func @_pconv_scale_stats_kernel(%arg0: i32, %arg1: i32, %arg2: memref<1x36x128xbf16, #tpu.memory_space<vmem>>, %arg3: memref<8x36xbf16, #tpu.memory_space<vmem>>, %arg4: memref<1x1x128xf32, #tpu.memory_space<vmem>>, %arg5: memref<1x8x128xf32, #tpu.memory_space<vmem>>, %arg6: memref<1x1x8x1xf32, #tpu.memory_space<vmem>>, %arg7: memref<1x1x8x1xf32, #tpu.memory_space<vmem>>) attributes {dimension_semantics = [#tpu.dimension_semantics<parallel>, #tpu.dimension_semantics<parallel>], iteration_bounds = array<i64: 2, 2>, scalar_prefetch = 0 : i64, scratch_operands = 0 : i64, tpu.core_type = #tpu.core_type<tc>, window_params = [{transform_indices = @transform_0, window_bounds = array<i64: 1, 36, 128>}, {pipeline_mode = #tpu.pipeline_mode<synchronous>, transform_indices = @transform_1, window_bounds = array<i64: 8, 36>}, {transform_indices = @transform_2, window_bounds = array<i64: 1, 1, 128>}, {transform_indices = @transform_3, window_bounds = array<i64: 1, 8, 128>}, {transform_indices = @transform_4, window_bounds = array<i64: 1, 1, 8, 1>}, {transform_indices = @transform_5, window_bounds = array<i64: 1, 1, 8, 1>}]} {
    %c0 = arith.constant 0 : index
    %c0_0 = arith.constant 0 : index
    %0 = vector.load %arg3[%c0, %c0_0] : memref<8x36xbf16, #tpu.memory_space<vmem>>, vector<8x36xbf16>
    %c0_1 = arith.constant 0 : index
    %c0_2 = arith.constant 0 : index
    %c0_3 = arith.constant 0 : index
    %1 = vector.load %arg2[%c0_1, %c0_2, %c0_3] : memref<1x36x128xbf16, #tpu.memory_space<vmem>>, vector<1x36x128xbf16>
    %2 = vector.shape_cast %1 : vector<1x36x128xbf16> to vector<36x128xbf16>
    %cst = arith.constant dense<0.000000e+00> : vector<8x128xf32>
    %3 = tpu.matmul %0, %2, %cst {dimension_numbers = #tpu.dot_dimension_numbers<[1], [0], [0], [1], [0, 0, 1, 1], [], []>} : vector<8x36xbf16>, vector<36x128xbf16>, vector<8x128xf32> -> vector<8x128xf32>
    %c0_4 = arith.constant 0 : index
    %c0_5 = arith.constant 0 : index
    %c0_6 = arith.constant 0 : index
    %4 = vector.load %arg4[%c0_4, %c0_5, %c0_6] : memref<1x1x128xf32, #tpu.memory_space<vmem>>, vector<1x1x128xf32>
    %5 = vector.shape_cast %4 : vector<1x1x128xf32> to vector<1x128xf32>
    %6 = vector.broadcast %5 : vector<1x128xf32> to vector<8x128xf32>
    %7 = arith.mulf %3, %6 : vector<8x128xf32>
    %c0_7 = arith.constant 0 : index
    %c0_8 = arith.constant 0 : index
    %c0_9 = arith.constant 0 : index
    %8 = vector.load %arg5[%c0_7, %c0_8, %c0_9] : memref<1x8x128xf32, #tpu.memory_space<vmem>>, vector<1x8x128xf32>
    %9 = vector.shape_cast %8 : vector<1x8x128xf32> to vector<8x128xf32>
    %10 = vector.shape_cast %7 : vector<8x128xf32> to vector<1x8x128xf32>
    tpu.vector_store %arg5[%c0_7, %c0_8, %c0_9], %10 {strides = array<i32>} : memref<1x8x128xf32, #tpu.memory_space<vmem>>, vector<1x8x128xf32>,
    %cst_10 = arith.constant dense<0.000000e+00> : vector<8xf32>
    %11 = vector.multi_reduction <add>, %7, %cst_10 [1] : vector<8x128xf32> to vector<8xf32>
    %12 = vector.shape_cast %11 : vector<8xf32> to vector<8x1xf32>
    %c0_11 = arith.constant 0 : index
    %c0_12 = arith.constant 0 : index
    %c0_13 = arith.constant 0 : index
    %c0_14 = arith.constant 0 : index
    %13 = vector.load %arg6[%c0_11, %c0_12, %c0_13, %c0_14] : memref<1x1x8x1xf32, #tpu.memory_space<vmem>>, vector<1x1x8x1xf32>
    %14 = vector.shape_cast %13 : vector<1x1x8x1xf32> to vector<8x1xf32>
    %15 = vector.shape_cast %12 : vector<8x1xf32> to vector<1x1x8x1xf32>
    tpu.vector_store %arg6[%c0_11, %c0_12, %c0_13, %c0_14], %15 {strides = array<i32>} : memref<1x1x8x1xf32, #tpu.memory_space<vmem>>, vector<1x1x8x1xf32>,
    %16 = arith.mulf %7, %7 : vector<8x128xf32>
    %cst_15 = arith.constant dense<0.000000e+00> : vector<8xf32>
    %17 = vector.multi_reduction <add>, %16, %cst_15 [1] : vector<8x128xf32> to vector<8xf32>
    %18 = vector.shape_cast %17 : vector<8xf32> to vector<8x1xf32>
    %c0_16 = arith.constant 0 : index
    %c0_17 = arith.constant 0 : index
    %c0_18 = arith.constant 0 : index
    %c0_19 = arith.constant 0 : index
    %19 = vector.load %arg7[%c0_16, %c0_17, %c0_18, %c0_19] : memref<1x1x8x1xf32, #tpu.memory_space<vmem>>, vector<1x1x8x1xf32>
    %20 = vector.shape_cast %19 : vector<1x1x8x1xf32> to vector<8x1xf32>
    %21 = vector.shape_cast %18 : vector<8x1xf32> to vector<1x1x8x1xf32>
    tpu.vector_store %arg7[%c0_16, %c0_17, %c0_18, %c0_19], %21 {strides = array<i32>} : memref<1x1x8x1xf32, #tpu.memory_space<vmem>>, vector<1x1x8x1xf32>,
    return
  }
  func.func @transform_0(%arg0: i32, %arg1: i32) -> (i32, i32, i32) {
    %c0_i32 = arith.constant 0 : i32
    %c0_i32_0 = arith.constant 0 : i32
    return %arg0, %c0_i32, %arg1 : i32, i32, i32
  }
  func.func @transform_1(%arg0: i32, %arg1: i32) -> (i32, i32) {
    %c0_i32 = arith.constant 0 : i32
    %c0_i32_0 = arith.constant 0 : i32
    %c0_i32_1 = arith.constant 0 : i32
    return %c0_i32, %c0_i32_0 : i32, i32
  }
  func.func @transform_2(%arg0: i32, %arg1: i32) -> (i32, i32, i32) {
    %c0_i32 = arith.constant 0 : i32
    %c0_i32_0 = arith.constant 0 : i32
    return %arg0, %c0_i32, %arg1 : i32, i32, i32
  }
  func.func @transform_3(%arg0: i32, %arg1: i32) -> (i32, i32, i32) {
    %c0_i32 = arith.constant 0 : i32
    %c0_i32_0 = arith.constant 0 : i32
    return %arg0, %c0_i32, %arg1 : i32, i32, i32
  }
  func.func @transform_4(%arg0: i32, %arg1: i32) -> (i32, i32, i32, i32) {
    %c0_i32 = arith.constant 0 : i32
    %c0_i32_0 = arith.constant 0 : i32
    %c0_i32_1 = arith.constant 0 : i32
    return %arg0, %arg1, %c0_i32, %c0_i32_0 : i32, i32, i32, i32
  }
  func.func @transform_5(%arg0: i32, %arg1: i32) -> (i32, i32, i32, i32) {
    %c0_i32 = arith.constant 0 : i32
    %c0_i32_0 = arith.constant 0 : i32
    %c0_i32_1 = arith.constant 0 : i32
    return %arg0, %arg1, %c0_i32, %c0_i32_0 : i32, i32, i32, i32
  }
}

module attributes {stable_mosaic.version = 11 : i64} {
  func.func @_bn_relu_kernel(%arg0: i32, %arg1: i32, %arg2: memref<1x8x128xf32, #tpu.memory_space<vmem>>, %arg3: memref<8x1xf32, #tpu.memory_space<vmem>>, %arg4: memref<8x1xf32, #tpu.memory_space<vmem>>, %arg5: memref<1x8x128xf32, #tpu.memory_space<vmem>>) attributes {dimension_semantics = [#tpu.dimension_semantics<parallel>, #tpu.dimension_semantics<parallel>], iteration_bounds = array<i64: 2, 2>, scalar_prefetch = 0 : i64, scratch_operands = 0 : i64, tpu.core_type = #tpu.core_type<tc>, window_params = [{transform_indices = @transform_0, window_bounds = array<i64: 1, 8, 128>}, {pipeline_mode = #tpu.pipeline_mode<synchronous>, transform_indices = @transform_1, window_bounds = array<i64: 8, 1>}, {pipeline_mode = #tpu.pipeline_mode<synchronous>, transform_indices = @transform_2, window_bounds = array<i64: 8, 1>}, {transform_indices = @transform_3, window_bounds = array<i64: 1, 8, 128>}]} {
    %c0 = arith.constant 0 : index
    %c0_0 = arith.constant 0 : index
    %c0_1 = arith.constant 0 : index
    %0 = vector.load %arg2[%c0, %c0_0, %c0_1] : memref<1x8x128xf32, #tpu.memory_space<vmem>>, vector<1x8x128xf32>
    %1 = vector.shape_cast %0 : vector<1x8x128xf32> to vector<8x128xf32>
    %c0_2 = arith.constant 0 : index
    %c0_3 = arith.constant 0 : index
    %2 = vector.load %arg3[%c0_2, %c0_3] : memref<8x1xf32, #tpu.memory_space<vmem>>, vector<8x1xf32>
    %3 = vector.broadcast %2 : vector<8x1xf32> to vector<8x128xf32>
    %4 = arith.mulf %1, %3 : vector<8x128xf32>
    %c0_4 = arith.constant 0 : index
    %c0_5 = arith.constant 0 : index
    %5 = vector.load %arg4[%c0_4, %c0_5] : memref<8x1xf32, #tpu.memory_space<vmem>>, vector<8x1xf32>
    %6 = vector.broadcast %5 : vector<8x1xf32> to vector<8x128xf32>
    %7 = arith.addf %4, %6 : vector<8x128xf32>
    %cst = arith.constant 0.000000e+00 : f32
    %8 = vector.broadcast %cst : f32 to vector<8x128xf32>
    %9 = arith.maximumf %7, %8 : vector<8x128xf32>
    %c0_6 = arith.constant 0 : index
    %c0_7 = arith.constant 0 : index
    %c0_8 = arith.constant 0 : index
    %10 = vector.load %arg5[%c0_6, %c0_7, %c0_8] : memref<1x8x128xf32, #tpu.memory_space<vmem>>, vector<1x8x128xf32>
    %11 = vector.shape_cast %10 : vector<1x8x128xf32> to vector<8x128xf32>
    %12 = vector.shape_cast %9 : vector<8x128xf32> to vector<1x8x128xf32>
    tpu.vector_store %arg5[%c0_6, %c0_7, %c0_8], %12 {strides = array<i32>} : memref<1x8x128xf32, #tpu.memory_space<vmem>>, vector<1x8x128xf32>,
    return
  }
  func.func @transform_0(%arg0: i32, %arg1: i32) -> (i32, i32, i32) {
    %c0_i32 = arith.constant 0 : i32
    %c0_i32_0 = arith.constant 0 : i32
    return %arg0, %c0_i32, %arg1 : i32, i32, i32
  }
  func.func @transform_1(%arg0: i32, %arg1: i32) -> (i32, i32) {
    %c0_i32 = arith.constant 0 : i32
    %c0_i32_0 = arith.constant 0 : i32
    %c0_i32_1 = arith.constant 0 : i32
    return %c0_i32, %c0_i32_0 : i32, i32
  }
  func.func @transform_2(%arg0: i32, %arg1: i32) -> (i32, i32) {
    %c0_i32 = arith.constant 0 : i32
    %c0_i32_0 = arith.constant 0 : i32
    %c0_i32_1 = arith.constant 0 : i32
    return %c0_i32, %c0_i32_0 : i32, i32
  }
  func.func @transform_3(%arg0: i32, %arg1: i32) -> (i32, i32, i32) {
    %c0_i32 = arith.constant 0 : i32
    %c0_i32_0 = arith.constant 0 : i32
    return %arg0, %c0_i32, %arg1 : i32, i32, i32
  }
}

</mosaic_0001>

<bundles_post_ra>
// kernel: mul.5
= control target key start
LH: loop header
LB: loop body
LE: loop exit
PB: predicated region body
PF: predicated region fallthrough
CT: control target
= control target key end

     0   :  { %3 = vsyncpa [#allocation1], 0  ;;  %s378_s0 = inlined_call_operand.hbm [shape: f32[2,4,16,16], index: 0, kind: input, shape index: {}]   ;;  %s379_s1 = inlined_call_operand.hbm [shape: f32[2,4,16,16], index: 1, kind: input, shape index: {}]   ;;  %s380_s2 = inlined_call_operand.vmem [shape: bf16[2,4,16,16], index: 2, kind: output, shape index: {}]  }
   0x1   :  { %4 = vsyncpa [#allocation3], 0  ;;  %s270_s9 = smov [#allocation0]   ;;  %s222_s13 = scalar_lea.hbm %s378_s0, 2048 }
   0x2   :  { %s8_s10 = sshll.u32 %s270_s9, 4  ;;  %p223_p0 = scmp.ne.s32.totalorder %s378_s0, %s222_s13  ;;  %s9_s10 = int_to_ptr.vmem [resolvable:$true] %s8_s10 }
   0x3   :  { %p226_p1 = scmp.lt.u32.totalorder %s222_s13, %s378_s0 }
   0x5   :  { %p228_p2 = pnand %p226_p1, %p223_p0 }
   0x7   :  { %231 = shalt.err (!%p228_p2)
}
   0x8   :  { %s232_s18 = scalar_lea.vmem %s9_s10, 2048  ;;  %p237_p4 = scmp.lt.s32.totalorder %s9_s10, %s9_s10 }
   0x9   :  { %p233_p3 = scmp.ne.s32.totalorder %s9_s10, %s232_s18  ;;  %p238_p5 = scmp.lt.s32.totalorder %s232_s18, %s232_s18 }
   0xb   :  { %p239_p6 = por %p238_p5, %p237_p4 }
   0xd   :  { %p240_p7 = pnand %p239_p6, %p233_p3 }
   0xf   :  { %243 = shalt.err (!%p240_p7)
}
  0x10   :  { %s271_s19 = smov 128   ;;  %s272_s20 = smov 8  }
  0x11   :  { %14 = dma.hbm_to_vmem [thread:$0]  %s378_s0, 2048, %s9_s10, [#allocation1], %s271_s19, %s271_s19, %s272_s20  }
  0x12   :  { %s273_s0 = smov [#allocation2]   ;;  %s244_s26 = scalar_lea.hbm %s379_s1, 2048 }
  0x13   :  { %s18_s23 = sshll.u32 %s273_s0, 4  ;;  %p245_p8 = scmp.ne.s32.totalorder %s379_s1, %s244_s26  ;;  %s19_s23 = int_to_ptr.vmem [resolvable:$true] %s18_s23 }
  0x14   :  { %p248_p9 = scmp.lt.u32.totalorder %s244_s26, %s379_s1 }
  0x16   :  { %p250_p10 = pnand %p248_p9, %p245_p8 }
  0x18   :  { %253 = shalt.err (!%p250_p10)
}
  0x19   :  { %s254_s3 = scalar_lea.vmem %s19_s23, 2048  ;;  %p259_p12 = scmp.lt.s32.totalorder %s19_s23, %s19_s23 }
  0x1a   :  { %p255_p11 = scmp.ne.s32.totalorder %s19_s23, %s254_s3  ;;  %p260_p13 = scmp.lt.s32.totalorder %s254_s3, %s254_s3 }
  0x1c   :  { %p261_p0 = por %p260_p13, %p259_p12 }
  0x1e   :  { %p262_p1 = pnand %p261_p0, %p255_p11 }
  0x20   :  { %265 = shalt.err (!%p262_p1)
}
  0x21   :  { %24 = dma.hbm_to_vmem [thread:$0]  %s379_s1, 2048, %s19_s23, [#allocation3], %s271_s19, %s271_s19, %s272_s20  }
  0x22   :  { %266 = dma.done.wait [#allocation1], 2048  }
  0x23   :  { %267 = vsyncadd [#allocation1], 4294965248 }
  0x24   :  { %268 = dma.done.wait [#allocation3], 2048  }
  0x25   :  { %269 = vsyncadd [#allocation3], 4294965248  ;;  %v27_v0 = vld [vmem:[#allocation0] sm:$0xff]  ;;  %v47_v5 = vld [vmem:[#allocation0 + $0x10] sm:$0xff]  ;;  %v274_v12 = vmov 0.0  }
  0x26   :  { %v28_v1 = vld [vmem:[#allocation2] sm:$0xff]  ;;  %v49_v6 = vld [vmem:[#allocation2 + $0x10] sm:$0xff]  ;;  %v113_v28 = vld [vmem:[#allocation0 + $0x8] sm:$0xff] }
  0x27   :  { %v36_v2 = vld [vmem:[#allocation0 + $0x40] sm:$0xff]  ;;  %v31_v3 = vmul.f32 %v28_v1, %v27_v0  ;;  %v52_v8 = vmul.f32 %v49_v6, %v47_v5  ;;  %v58_v9 = vld [vmem:[#allocation0 + $0x50] sm:$0xff]  ;;  %v115_v29 = vld [vmem:[#allocation2 + $0x8] sm:$0xff] }
  0x28   :  { %v38_v4 = vld [vmem:[#allocation2 + $0x40] sm:$0xff]  ;;  %v60_v10 = vld [vmem:[#allocation2 + $0x50] sm:$0xff]  ;;  %v118_v33 = vmul.f32 %v115_v29, %v113_v28  ;;  %v124_v34 = vld [vmem:[#allocation0 + $0x48] sm:$0xff] }
  0x29   :  { %v41_v7 = vmul.f32 %v38_v4, %v36_v2  ;;  %v69_v11 = vld [vmem:[#allocation0 + $0x20] sm:$0xff]  ;;  %v33_v13 = vpack.c.bf16 %v274_v12, %v31_v3  ;;  %v63_v14 = vmul.f32 %v60_v10, %v58_v9  ;;  %v55_v19 = vpack.c.bf16 %v274_v12, %v52_v8  ;;  %v91_v22 = vld [vmem:[#allocation0 + $0x30] sm:$0xff]  ;;  %v126_v35 = vld [vmem:[#allocation2 + $0x48] sm:$0xff] }
  0x2a   :  { %v71_v15 = vld [vmem:[#allocation2 + $0x20] sm:$0xff]  ;;  %v93_v23 = vld [vmem:[#allocation2 + $0x30] sm:$0xff]  ;;  %v135_v36 = vld [vmem:[#allocation0 + $0x18] sm:$0xff]  ;;  %v129_v38 = vmul.f32 %v126_v35, %v124_v34  ;;  %v121_v43 = vpack.c.bf16 %v274_v12, %v118_v33 }
  0x2b   :  { %v80_v16 = vld [vmem:[#allocation0 + $0x60] sm:$0xff]  ;;  %v44_v18 = vpack.c.bf16 %v274_v12, %v41_v7  ;;  %v74_v20 = vmul.f32 %v71_v15, %v69_v11  ;;  %v102_v24 = vld [vmem:[#allocation0 + $0x70] sm:$0xff]  ;;  %34 = vst [vmem:[%s380_s2] sm:$0xf] %v33_v13  ;;  %v66_v25 = vpack.c.bf16 %v274_v12, %v63_v14  ;;  %v96_v26 = vmul.f32 %v93_v23, %v91_v22  ;;  %v137_v39 = vld [vmem:[#allocation2 + $0x18] sm:$0xff] }
  0x2c   :  { %v82_v17 = vld [vmem:[#allocation2 + $0x60] sm:$0xff]  ;;  %v104_v27 = vld [vmem:[#allocation2 + $0x70] sm:$0xff]  ;;  %203 = vst [vmem:[%s380_s2 + $0x8] sm:$0xf] %v55_v19  ;;  %v146_v40 = vld [vmem:[#allocation0 + $0x58] sm:$0xff]  ;;  %v140_v44 = vmul.f32 %v137_v39, %v135_v36  ;;  %v132_v49 = vpack.c.bf16 %v274_v12, %v129_v38 }
  0x2d   :  { %v85_v21 = vmul.f32 %v82_v17, %v80_v16  ;;  %202 = vst [vmem:[%s380_s2 + $0x20] sm:$0xf] %v44_v18  ;;  %v77_v30 = vpack.c.bf16 %v274_v12, %v74_v20  ;;  %v107_v32 = vmul.f32 %v104_v27, %v102_v24  ;;  %204 = vst [vmem:[%s380_s2 + $0x28] sm:$0xf] %v66_v25  ;;  %v148_v41 = vld [vmem:[#allocation2 + $0x58] sm:$0xff]  ;;  %v157_v46 = vld [vmem:[#allocation0 + $0x28] sm:$0xff] }
  0x2e   :  { %v99_v37 = vpack.c.bf16 %v274_v12, %v96_v26  ;;  %v151_v45 = vmul.f32 %v148_v41, %v146_v40  ;;  %v159_v47 = vld [vmem:[#allocation2 + $0x28] sm:$0xff]  ;;  %v179_v52 = vld [vmem:[#allocation0 + $0x38] sm:$0xff]  ;;  %209 = vst [vmem:[%s380_s2 + $0x4] sm:$0xf] %v121_v43  ;;  %v143_v54 = vpack.c.bf16 %v274_v12, %v140_v44  ;;  %210 = vst [vmem:[%s380_s2 + $0x24] sm:$0xf] %v132_v49 }
  0x2f   :  { %v88_v31 = vpack.c.bf16 %v274_v12, %v85_v21  ;;  %205 = vst [vmem:[%s380_s2 + $0x10] sm:$0xf] %v77_v30  ;;  %v110_v42 = vpack.c.bf16 %v274_v12, %v107_v32  ;;  %v168_v48 = vld [vmem:[#allocation0 + $0x68] sm:$0xff]  ;;  %v162_v50 = vmul.f32 %v159_v47, %v157_v46  ;;  %v181_v53 = vld [vmem:[#allocation2 + $0x38] sm:$0xff] }
  0x30   :  { %207 = vst [vmem:[%s380_s2 + $0x18] sm:$0xf] %v99_v37  ;;  %v170_v51 = vld [vmem:[#allocation2 + $0x68] sm:$0xff]  ;;  %v154_v55 = vpack.c.bf16 %v274_v12, %v151_v45  ;;  %v184_v57 = vmul.f32 %v181_v53, %v179_v52  ;;  %v190_v58 = vld [vmem:[#allocation0 + $0x78] sm:$0xff]  ;;  %211 = vst [vmem:[%s380_s2 + $0xc] sm:$0xf] %v143_v54 }
  0x31   :  { %206 = vst [vmem:[%s380_s2 + $0x30] sm:$0xf] %v88_v31  ;;  %208 = vst [vmem:[%s380_s2 + $0x38] sm:$0xf] %v110_v42  ;;  %v173_v56 = vmul.f32 %v170_v51, %v168_v48  ;;  %v192_v59 = vld [vmem:[#allocation2 + $0x78] sm:$0xff]  ;;  %v165_v60 = vpack.c.bf16 %v274_v12, %v162_v50 }
  0x32   :  { %v195_v61 = vmul.f32 %v192_v59, %v190_v58  ;;  %212 = vst [vmem:[%s380_s2 + $0x2c] sm:$0xf] %v154_v55  ;;  %v187_v63 = vpack.c.bf16 %v274_v12, %v184_v57 }
  0x33   :  { %v176_v62 = vpack.c.bf16 %v274_v12, %v173_v56  ;;  %213 = vst [vmem:[%s380_s2 + $0x14] sm:$0xf] %v165_v60 }
  0x34   :  { %v198_v0 = vpack.c.bf16 %v274_v12, %v195_v61  ;;  %215 = vst [vmem:[%s380_s2 + $0x1c] sm:$0xf] %v187_v63 }
  0x35   :  { %214 = vst [vmem:[%s380_s2 + $0x34] sm:$0xf] %v176_v62 }
  0x36   :  { %216 = vst [vmem:[%s380_s2 + $0x3c] sm:$0xf] %v198_v0 }
  0x37   :  { %200 = vsyncpa [#allocation1], 1 }
  0x38   :  { %201 = vsyncpa [#allocation3], 1 }

// kernel: pconv_bn_activ_forward.3
= control target key start
LH: loop header
LB: loop body
LE: loop exit
PB: predicated region body
PF: predicated region fallthrough
CT: control target
= control target key end

     0   :  { %s419_s12 = smov 0   ;;  %s421_s13 = smov 0   ;;  %s476_s0 = inlined_call_operand.vmem [shape: f32[2,8,256], index: 0, kind: input, shape index: {}, may-alias: {0,3}]   ;;  %s477_s1 = inlined_call_operand.vmem [shape: f32[8,1], index: 1, kind: input, shape index: {}]   ;;  %s478_s2 = inlined_call_operand.vmem [shape: f32[8,1], index: 2, kind: input, shape index: {}]   ;;  %s479_s3 = inlined_call_operand.vmem [shape: f32[2,8,256], index: 3, kind: output, shape index: {}, may-alias: {0,3}]  }
   0x1   :  { %s423_s14 = smov 0   ;;  %s425_s15 = smov 0  }
   0x2   :  { %s427_s16 = smov 0  }
   0x3 LB: > { %s22_s17 = sadd.s32 1, %s388_s14  ;;  %s25_s18 = sadd.s32 1, %s392_s15  ;;  %s396_s16 = sphi %s427_s16, %s13_s16   ;;  %s392_s15 = sphi %s425_s15, %s483_s15   ;;  %s388_s14 = sphi %s423_s14, %s482_s14   ;;  %s384_s13 = sphi %s421_s13, %s481_s13   ;;  %s380_s12 = sphi %s419_s12, %s480_s12  }
   0x4   : > { %p23_p0 = scmp.ge.s32.totalorder %s22_s17, 2  ;;  %p309_p1 = scmp.ge.s32.totalorder %s396_s16, 1 }
   0x5   : > { %p156_p2 = scmp.lt.s32.totalorder %s396_s16, 5 }
   0x6   : > { %s485_s17 = smov (%p23_p0, %s22_s17), 0  ;;  %s487_s18 = smov (!%p23_p0, %s25_s18), %s392_s15 }
   0x7   : > { %p157_p3 = pnand %p309_p1, %p156_p2  ;;  %p27_p4 = scmp.ge.s32.totalorder %s487_s18, 2 }
   0x8   : > { %v203_v0 = vld [vmem:[%s477_s1] sm:$0xff] (!%p157_p3)  ;;  %v398_v1 = vmov (!%p157_p3), 0   ;;  %p186_p5 = scmp.lt.s32.totalorder (!%p157_p3), %s384_s13, 1  ;;  %p188_p6 = scmp.lt.s32.totalorder (!%p157_p3), %s380_s12, 1 }
   0x9   : > { %s489_s18 = smov (%p27_p4, %s487_s18), 0  ;;  %160 = sbr.rel (%p157_p3) target bundleno = 148 (0x94), region = 32 }
   0xa   : > { %357 = vset.pattern.permute.xlu0 (!%p157_p3), %v398_v1  ;;  %v210_v2 = vld [vmem:[%s478_s2] sm:$0xff] (!%p157_p3) }
   0xb   : > { %206 = vperm.xlu0 (!%p157_p3), %357, %v203_v0  }
   0xf   : > { %213 = vperm.xlu0 (!%p157_p3), %357, %v210_v2  }
  0x10   : > { %s491_s13 = smov (!%p186_p5, %s384_s13), 1  ;;  %s493_s12 = smov (!%p188_p6, %s380_s12), 1 }
  0x11   : > { %s310_s23 = sshll.u32 %s491_s13, 1 }
  0x12   : > { %s191_s24 = sadd.s32 %s310_s23, %s493_s12 }
  0x13   : > { %s311_s25 = sshll.u32 %s191_s24, 3 }
  0x14   : > { %s193_s28 = scalar_lea.vmem %s476_s0, %s311_s25  ;;  %s201_s4 = scalar_lea.vmem %s479_s3, %s311_s25 }
  0x15   : > { %v202_v4 = vld [vmem:[%s193_s28] sm:$0xff] }
  0x8a   : > { %v207_v3 = vpop.permute.xlu0 %206 }
  0x8b   : > { %v209_v5 = vmul.f32 %v207_v3, %v202_v4 }
  0x8e   : > { %v214_v6 = vpop.permute.xlu0 %213 }
  0x8f   : > { %v216_v7 = vadd.f32 %v214_v6, %v209_v5 }
  0x91   : > { %v217_v8 = vmax.f32 %v216_v7, 0.0 }
  0x93   : > { %218 = vst [vmem:[%s201_s4] sm:$0xff] %v217_v8 }
  0x94 PF: > { %s13_s16 = sadd.s32 1, %s396_s16   ;;  %s480_s12 = smov %s388_s14 }
  0x95   : > { %p10_p7 = scmp.ge.s32.totalorder %s13_s16, 6   ;;  %s481_s13 = smov %s392_s15 }
  0x96   : > { %s482_s14 = smov %s485_s17  ;;  %s483_s15 = smov %s489_s18 }
  0x97   :  { %12 = sbr.rel (!%p10_p7) target bundleno = 3 (0x3), region = 62 }

// kernel: pconv_bn_activ_forward.2
= control target key start
LH: loop header
LB: loop body
LE: loop exit
PB: predicated region body
PF: predicated region fallthrough
CT: control target
= control target key end

     0   :  { %s845_s18 = smov 0   ;;  %s847_s19 = smov 0   ;;  %s948_s0 = inlined_call_operand.vmem [shape: bf16[2,36,256], index: 0, kind: input, shape index: {}]   ;;  %s949_s1 = inlined_call_operand.vmem [shape: bf16[8,36], index: 1, kind: input, shape index: {}]   ;;  %s950_s2 = inlined_call_operand.vmem [shape: f32[2,1,256], index: 2, kind: input, shape index: {}]   ;;  %s951_s3 = inlined_call_operand.vmem [shape: f32[2,8,256], index: 3, kind: output, shape index: {0}]   ;;  %s952_s4 = inlined_call_operand.vmem [shape: f32[2,2,8,1], index: 4, kind: output, shape index: {1}]   ;;  %s953_s5 = inlined_call_operand.vmem [shape: f32[2,2,8,1], index: 5, kind: output, shape index: {2}]  }
   0x1   :  { %s849_s20 = smov 0   ;;  %s851_s21 = smov 0  }
   0x2   :  { %s853_s22 = smov 0   ;;  %s855_s23 = smov 0  }
   0x3   :  { %s857_s24 = smov 0  }
   0x4 LB: > { %s25_s25 = sadd.s32 1, %s803_s22  ;;  %s28_s26 = sadd.s32 1, %s807_s23  ;;  %s811_s24 = sphi %s857_s24, %s16_s24   ;;  %s807_s23 = sphi %s855_s23, %s959_s23   ;;  %s803_s22 = sphi %s853_s22, %s958_s22   ;;  %s799_s21 = sphi %s851_s21, %s957_s21   ;;  %s795_s20 = sphi %s849_s20, %s956_s20   ;;  %s791_s19 = sphi %s847_s19, %s955_s19   ;;  %s787_s18 = sphi %s845_s18, %s954_s18  }
   0x5   : > { %p26_p0 = scmp.ge.s32.totalorder %s25_s25, 2  ;;  %p44_p1 = scmp.ne.s32.totalorder %s791_s19, %s787_s18 }
   0x6   : > { %p45_p2 = scmp.eq.s32.totalorder %s811_s24, 0  ;;  %s37_s30 = sadd.s32 1, %s791_s19 }
   0x7   : > { %s961_s25 = smov (%p26_p0, %s25_s25), 0  ;;  %s963_s26 = smov (!%p26_p0, %s28_s26), %s807_s23 }
   0x8   : > { %p46_p3 = por %p45_p2, %p44_p1  ;;  %p30_p4 = scmp.ge.s32.totalorder %s963_s26, 2 }
   0x9   : > { %s33_s27 = ssub.s32 %s803_s22, %s961_s25  ;;  %p662_p6 = scmp.ge.s32.totalorder %s811_s24, 4 }
   0xa   : > { %s965_s26 = smov (%p30_p4, %s963_s26), 0 }
   0xb   : > { %s32_s28 = ssub.s32 %s807_s23, %s965_s26  ;;  %206 = sbr.rel (%p662_p6) target bundleno = 28 (0x1c), region = 20 }
   0xc   : > { %s34_s29 = sor.u32 %s33_s27, %s32_s28 }
   0xd   : > { %p35_p5 = scmp.eq.s32.totalorder %s34_s29, 0 }
   0xf   : > { %s896_s6 = scalar_select %p35_p5, %s791_s19, %s37_s30  }
  0x12   : > { %209 = sbr.rel (!%p46_p3) target bundleno = 28 (0x1c), region = 24  ;;  %s211_s7 = sand.u32 (%p46_p3), 1, %s791_s19  }
  0x13   : > { %s694_s8 = smul.u32 (%p46_p3), 10, %s807_s23 }
  0x14   : > { %s693_s9 = smul.u32 (%p46_p3), 20, %s211_s7 }
  0x15   : > { %s215_s10 = sadd.s32 (%p46_p3), %s803_s22, %s694_s8 }
  0x16   : > { %s663_s11 = sshll.u32 (%p46_p3), %s215_s10, 2  ;;  %s213_s15 = scalar_lea.vmem (%p46_p3), [#allocation2], %s693_s9 }
  0x17   : > { %s217_s14 = scalar_lea.vmem (%p46_p3), %s948_s0, %s663_s11 }
  0x18   : > { %v233_v0 = vld [vmem:[%s217_s14] sm:$0xf] (%p46_p3)  ;;  %v235_v1 = vld [vmem:[%s217_s14 + $0x8] sm:$0xf] (%p46_p3)  ;;  %v237_v2 = vld [vmem:[%s217_s14 + $0x10] sm:$0xf] (%p46_p3) }
  0x19   : > { %234 = vst [vmem:[%s213_s15] sm:$0xf] %v233_v0  ;;  %236 = vst [vmem:[%s213_s15 + $0x4] sm:$0xf] %v235_v1  ;;  %v239_v3 = vld [vmem:[%s217_s14 + $0x18] sm:$0xf] }
  0x1a   : > { %238 = vst [vmem:[%s213_s15 + $0x8] sm:$0xf] %v237_v2  ;;  %v241_v4 = vld [vmem:[%s217_s14 + $0x20] sm:$0xf]  ;;  %240 = vst [vmem:[%s213_s15 + $0xc] sm:$0xf] %v239_v3 }
  0x1b   : > { %242 = vst [vmem:[%s213_s15 + $0x10] sm:$0xf] %v241_v4 }
  0x1c PF: > { %p664_p7 = scmp.ge.s32.totalorder %s811_s24, 1  ;;  %p284_p8 = scmp.lt.s32.totalorder %s811_s24, 5 }
  0x1e   : > { %p285_p9 = pnand %p664_p7, %p284_p8 }
  0x1f   : > { %s291_s16 = sand.u32 (!%p285_p9), 1, %s787_s18   ;;  %v813_v5 = vmov (!%p285_p9), 0.0   ;;  %vm814_vm0 = vmmov (!%p285_p9), 0   ;;  %vm401_vm1 = vcmask (!%p285_p9), 1041408   ;;  %v376_v10 = vld [vmem:[%s949_s1] sm:$0xf] (!%p285_p9) }
  0x20   : > { %288 = sbr.rel (%p285_p9) target bundleno = 409 (0x199), region = 69  ;;  %683 = vmatprep.subr.bf16.mxu0 (!%p285_p9), %v813_v5  ;;  %689 = vmatprep.mubr.msk.bf16.mxu0 (!%p285_p9), %vm814_vm0, %v813_v5  ;;  %vm397_vm2 = vcmask (!%p285_p9), 293888   ;;  %p344_p10 = scmp.lt.s32.totalorder (!%p285_p9), %s799_s21, 1  ;;  %vm456_vm3 = vcmask (!%p285_p9), 7168  }
  0x21   : > { %s695_s17 = smul.u32 (!%p285_p9), 20, %s291_s16  ;;  %p346_p11 = scmp.lt.s32.totalorder (!%p285_p9), %s795_s20, 1 }
  0x23   : > { %s293_s27 = scalar_lea.vmem (!%p285_p9), [#allocation2], %s695_s17 }
  0x24   : > { %v754_v6 = vld [vmem:[%s293_s27] sm:$0xff] (!%p285_p9)   ;;  %v755_v7 = vld [vmem:[%s293_s27 + $0x8] sm:$0xff] (!%p285_p9)   ;;  %v756_v8 = vld [vmem:[%s293_s27 + $0x10] ss:$0 sps:$4 sm:$0x33] (!%p285_p9)  }
  0x25   : > { %684 = vmatpush3.bf16.msra.mxu0 (!%p285_p9), %v754_v6  ;;  %v403_v9 = vsel (!%p285_p9), %vm401_vm1, %v756_v8, 0 }
  0x26   : > { %685 = vmatprep.subr.bf16.mxu0 (!%p285_p9), %v813_v5 }
  0x27   : > { %s967_s21 = smov (!%p344_p10, %s799_s21), 1  ;;  %s969_s20 = smov (!%p346_p11, %s795_s20), 1 }
  0x28   : > { %s665_s29 = sshll.u32 %s967_s21, 1 }
  0x29   : > { %686 = vmatpush3.bf16.msra.mxu0 %v755_v7  ;;  %s349_s30 = sadd.s32 %s665_s29, %s969_s20 }
  0x2a   : > { %687 = vmatprep.subr.bf16.mxu0 %v813_v5  ;;  %s350_s9 = scalar_lea.vmem %s950_s2, %s349_s30  ;;  %s667_s10 = sshll.u32 %s349_s30, 3 }
  0x2b   : > { %v676_v11 = vld [vmem:[%s350_s9] ss:$0 sm:$0xff]  ;;  %s358_s13 = scalar_lea.vmem %s951_s3, %s667_s10  ;;  %s366_s14 = scalar_lea.vmem %s952_s4, %s667_s10 }
  0x2c   : > { %s374_s17 = scalar_lea.vmem %s953_s5, %s667_s10 }
  0x2d   : > { %688 = vmatpush3.bf16.msra.mxu0 %v403_v9 }
  0x30   : > { %690 = vmatmul.mubr.msk.bf16.vlgmr.msra.gmra.mrb[0].mxu0 %vm397_vm2, %v376_v10 }
 0x103   : > { %v439_v12 = vpop.f32.mrb[0].mxu0 }
 0x104   : > { %v452_v13 = vmul.f32 %v676_v11, %v439_v12  ;;  %v691_v14 = vpop.f32.mrb[1].mxu0 }
 0x105   : > { %v442_v15 = vpop.f32.mrb[2].mxu0 }
 0x106   : > { %453 = vst [vmem:[%s358_s13] sm:$0xff] %v452_v13  ;;  %454 = vadd.xlane.f32.xlu0 %v452_v13  ;;  %v692_v16 = vpop.f32.mrb[3].mxu0  ;;  %v458_v17 = vmul.f32 %v452_v13, %v452_v13 }
 0x10a   : > { %459 = vadd.xlane.f32.xlu0 %v458_v17 }
 0x193   : > { %v455_v18 = vpop.xlane.xlu0 %454 }
 0x194   : > { %457 = vst.msk [vmem:[%s366_s14] sm:$0xff] %vm456_vm3, %v455_v18 }
 0x197   : > { %v460_v19 = vpop.xlane.xlu0 %459 }
 0x198   : > { %461 = vst.msk [vmem:[%s374_s17] sm:$0xff] %vm456_vm3, %v460_v19 }
 0x199 PF: > { %s16_s24 = sadd.s32 1, %s811_s24   ;;  %s954_s18 = smov %s791_s19 }
 0x19a   : > { %p13_p12 = scmp.ge.s32.totalorder %s16_s24, 6   ;;  %s955_s19 = smov %s896_s6 }
 0x19b   : > { %s956_s20 = smov %s803_s22  ;;  %s957_s21 = smov %s807_s23 }
 0x19c   : > { %s958_s22 = smov %s961_s25  ;;  %s959_s23 = smov %s965_s26 }
 0x19d   :  { %15 = sbr.rel (!%p13_p12) target bundleno = 4 (0x4), region = 135 }

</bundles_post_ra>
